<compile_context>
chip_gen: v7x
topology: tpu7x:2x2x1
jax: 0.10.0
libtpu: 0.0.40
codegen_flags: <defaults>
</compile_context>

<pallas_src>
import jax
import jax.numpy as jnp
from jax.experimental import pallas as pl
from jax.experimental.pallas import tpu as pltpu


def qactor_kernel(state_ref, ap_ref, w1s_ref, w1a_ref, b1_ref,
                  w2_ref, b2_ref, w3_ref, b3_ref, q_ref):
    # layer 1: Linear(obs_dim + ap_dim -> 128) + ReLU, with the concat folded
    # into two matmuls: [state | ap] @ [[w1_s],[w1_a]] == state@w1_s + ap@w1_a
    h1 = (jnp.dot(state_ref[...], w1s_ref[...], preferred_element_type=jnp.float32)
          + jnp.dot(ap_ref[...], w1a_ref[...], preferred_element_type=jnp.float32)
          + b1_ref[...])
    h1 = jnp.maximum(h1, 0.0)
    # layer 2: Linear(128 -> 64) + ReLU
    h2 = jnp.dot(h1, w2_ref[...], preferred_element_type=jnp.float32) + b2_ref[...]
    h2 = jnp.maximum(h2, 0.0)
    # output layer: Linear(64 -> action_dim), no activation
    # TODO(synk): if a downstream consumer of Q exists (argmax / target calc),
    # fuse it here, or pad action_dim to a multiple of 128 so the final store
    # is lane-dense instead of masked (vst.msk).
    q = jnp.dot(h2, w3_ref[...], preferred_element_type=jnp.float32) + b3_ref[...]
    q_ref[...] = q.astype(q_ref.dtype)


def qactor_forward(state, action_parameters, params, *, batch_tile=256):
    """Pallas equivalent of QActor.forward(state, action_parameters)."""
    w1s, w1a, b1, w2, b2, w3, b3 = params
    batch, obs_dim = state.shape
    ap_dim = action_parameters.shape[1]
    action_dim = w3.shape[1]
    out_shape = jax.ShapeDtypeStruct((batch, action_dim), jnp.float32)
    args = (state, action_parameters, w1s, w1a, b1, w2, b2, w3, b3)

    # Grid path only when the batch cleanly tiles and there is more than one
    # tile; otherwise the grid-less path is both simpler and faster.
    use_grid = (batch % batch_tile == 0) and (batch // batch_tile > 1)

    if use_grid:
        tb = batch_tile
        grid = (batch // tb,)

        def row_spec(cols):
            # (tb, cols): tb is a multiple of 8; cols equals the full array
            # extent, so the (8,128) constraint is satisfied for any cols.
            return pl.BlockSpec((tb, cols), lambda i: (i, 0))

        def resident_spec(shape):
            # Constant block index -> Pallas keeps the block VMEM-resident and
            # skips re-DMA across grid iterations (weights / biases).
            return pl.BlockSpec(shape, lambda i: (0, 0))

        in_specs = [
            row_spec(obs_dim),          # state
            row_spec(ap_dim),           # action_parameters
            resident_spec(w1s.shape),
            resident_spec(w1a.shape),
            resident_spec(b1.shape),
            resident_spec(w2.shape),
            resident_spec(b2.shape),
            resident_spec(w3.shape),
            resident_spec(b3.shape),
        ]
        out_specs = row_spec(action_dim)
        return pl.pallas_call(
            qactor_kernel,
            out_shape=out_shape,
            grid=grid,
            in_specs=in_specs,
            out_specs=out_specs,
            compiler_params=pltpu.CompilerParams(
                # Independent batch blocks: shard the grid across TensorCores
                # on megacore parts (v7x).
                dimension_semantics=("parallel",)),
        )(*args)

    # Tiny-batch / non-divisible path: everything fits trivially in VMEM; a
    # grid would only add per-step pipeline overhead.  Full-array blocks keep
    # the non-(8,128)-aligned dims (obs_dim, ap_dim, 64, action_dim) legal.
    vmem_spec = pl.BlockSpec(memory_space=pltpu.MemorySpace.VMEM)
    return pl.pallas_call(
        qactor_kernel,
        out_shape=out_shape,
        in_specs=[vmem_spec] * 9,
        out_specs=vmem_spec,
    )(*args)


def init_params(key, obs_dim, action_dim, action_parameter_dim):
    """Deterministic init mirroring QActor.__init__ (kaiming_normal / zeros / normal).

    Layer-1 weight is generated as one (obs+ap, 128) matrix and split into the
    state / action-parameter halves so the two-dot formulation is bit-identical
    to concat-then-matmul.
    """
    in_dim = obs_dim + action_parameter_dim
    k1, k2, k3 = jax.random.split(key, 3)

    # kaiming_normal_(nonlinearity='relu'): std = sqrt(2 / fan_in).
    w1 = jax.random.normal(k1, (in_dim, 128), jnp.float32) * jnp.sqrt(2.0 / in_dim)
    w1s, w1a = w1[:obs_dim], w1[obs_dim:]
    b1 = jnp.zeros((1, 128), jnp.float32)
    w2 = jax.random.normal(k2, (128, 64), jnp.float32) * jnp.sqrt(2.0 / 128)
    b2 = jnp.zeros((1, 64), jnp.float32)
    # action_output_layer: normal(mean=0, std=1e-5), zero bias.
    w3 = jax.random.normal(k3, (64, action_dim), jnp.float32) * 1e-5
    b3 = jnp.zeros((1, action_dim), jnp.float32)
    return (w1s, w1a, b1, w2, b2, w3, b3)


def _reference(state, action_parameters, params):
    """Plain-JAX reference, same math as the PyTorch forward."""
    w1s, w1a, b1, w2, b2, w3, b3 = params
    x = jnp.concatenate([state, action_parameters], axis=1)
    w1 = jnp.concatenate([w1s, w1a], axis=0)
    h1 = jnp.maximum(x @ w1 + b1, 0.0)
    h2 = jnp.maximum(h1 @ w2 + b2, 0.0)
    return h2 @ w3 + b3


if __name__ == "__main__":
    obs_dim = 16
    action_dim = 4
    action_parameter_dim = 8

    key = jax.random.PRNGKey(0)
    k_state, k_ap, k_params = jax.random.split(key, 3)
    params = init_params(k_params, obs_dim, action_dim, action_parameter_dim)

    # ---- tiny-batch path (grid-less, full-array VMEM) ----
    batch = 2
    state = jax.random.normal(k_state, (batch, obs_dim), jnp.float32)
    action_parameters = jax.random.normal(
        k_ap, (batch, action_parameter_dim), jnp.float32)

    q = qactor_forward(state, action_parameters, params)
    jax.block_until_ready(q)
    assert q.shape == (batch, action_dim), q.shape
    assert q.dtype == jnp.float32, q.dtype
    q_ref = _reference(state, action_parameters, params)
    assert jnp.allclose(q, q_ref, atol=1e-5, rtol=1e-5)

    # ---- batched path (1-D grid over batch, weights VMEM-resident) ----
    big_batch = 512
    k_bs, k_ba = jax.random.split(jax.random.PRNGKey(1))
    big_state = jax.random.normal(k_bs, (big_batch, obs_dim), jnp.float32)
    big_ap = jax.random.normal(k_ba, (big_batch, action_parameter_dim), jnp.float32)

    q_big = qactor_forward(big_state, big_ap, params, batch_tile=256)
    jax.block_until_ready(q_big)
    assert q_big.shape == (big_batch, action_dim), q_big.shape
    q_big_ref = _reference(big_state, big_ap, params)
    assert jnp.allclose(q_big, q_big_ref, atol=1e-5, rtol=1e-5)

    print("KERNEL_OK")
</pallas_src>

<mosaic_0001>
module attributes {stable_mosaic.version = 11 : i64} {
  func.func @qactor_kernel(%arg0: memref<2x16xf32, #tpu.memory_space<vmem>>, %arg1: memref<2x8xf32, #tpu.memory_space<vmem>>, %arg2: memref<16x128xf32, #tpu.memory_space<vmem>>, %arg3: memref<8x128xf32, #tpu.memory_space<vmem>>, %arg4: memref<1x128xf32, #tpu.memory_space<vmem>>, %arg5: memref<128x64xf32, #tpu.memory_space<vmem>>, %arg6: memref<1x64xf32, #tpu.memory_space<vmem>>, %arg7: memref<64x4xf32, #tpu.memory_space<vmem>>, %arg8: memref<1x4xf32, #tpu.memory_space<vmem>>, %arg9: memref<2x4xf32, #tpu.memory_space<vmem>>) attributes {dimension_semantics = [], scalar_prefetch = 0 : i64, scratch_operands = 0 : i64, tpu.core_type = #tpu.core_type<tc>} {
    %c0 = arith.constant 0 : index
    %c0_0 = arith.constant 0 : index
    %0 = vector.load %arg0[%c0, %c0_0] : memref<2x16xf32, #tpu.memory_space<vmem>>, vector<2x16xf32>
    %c0_1 = arith.constant 0 : index
    %c0_2 = arith.constant 0 : index
    %1 = vector.load %arg2[%c0_1, %c0_2] : memref<16x128xf32, #tpu.memory_space<vmem>>, vector<16x128xf32>
    %cst = arith.constant dense<0.000000e+00> : vector<2x128xf32>
    %2 = tpu.matmul %0, %1, %cst {dimension_numbers = #tpu.dot_dimension_numbers<[1], [0], [0], [1], [0, 0, 1, 1], [], []>} : vector<2x16xf32>, vector<16x128xf32>, vector<2x128xf32> -> vector<2x128xf32>
    %c0_3 = arith.constant 0 : index
    %c0_4 = arith.constant 0 : index
    %3 = vector.load %arg1[%c0_3, %c0_4] : memref<2x8xf32, #tpu.memory_space<vmem>>, vector<2x8xf32>
    %c0_5 = arith.constant 0 : index
    %c0_6 = arith.constant 0 : index
    %4 = vector.load %arg3[%c0_5, %c0_6] : memref<8x128xf32, #tpu.memory_space<vmem>>, vector<8x128xf32>
    %cst_7 = arith.constant dense<0.000000e+00> : vector<2x128xf32>
    %5 = tpu.matmul %3, %4, %cst_7 {dimension_numbers = #tpu.dot_dimension_numbers<[1], [0], [0], [1], [0, 0, 1, 1], [], []>} : vector<2x8xf32>, vector<8x128xf32>, vector<2x128xf32> -> vector<2x128xf32>
    %6 = arith.addf %2, %5 : vector<2x128xf32>
    %c0_8 = arith.constant 0 : index
    %c0_9 = arith.constant 0 : index
    %7 = vector.load %arg4[%c0_8, %c0_9] : memref<1x128xf32, #tpu.memory_space<vmem>>, vector<1x128xf32>
    %8 = vector.broadcast %7 : vector<1x128xf32> to vector<2x128xf32>
    %9 = arith.addf %6, %8 : vector<2x128xf32>
    %cst_10 = arith.constant 0.000000e+00 : f32
    %10 = vector.broadcast %cst_10 : f32 to vector<2x128xf32>
    %11 = arith.maximumf %9, %10 : vector<2x128xf32>
    %c0_11 = arith.constant 0 : index
    %c0_12 = arith.constant 0 : index
    %12 = vector.load %arg5[%c0_11, %c0_12] : memref<128x64xf32, #tpu.memory_space<vmem>>, vector<128x64xf32>
    %cst_13 = arith.constant dense<0.000000e+00> : vector<2x64xf32>
    %13 = tpu.matmul %11, %12, %cst_13 {dimension_numbers = #tpu.dot_dimension_numbers<[1], [0], [0], [1], [0, 0, 1, 1], [], []>} : vector<2x128xf32>, vector<128x64xf32>, vector<2x64xf32> -> vector<2x64xf32>
    %c0_14 = arith.constant 0 : index
    %c0_15 = arith.constant 0 : index
    %14 = vector.load %arg6[%c0_14, %c0_15] : memref<1x64xf32, #tpu.memory_space<vmem>>, vector<1x64xf32>
    %15 = vector.broadcast %14 : vector<1x64xf32> to vector<2x64xf32>
    %16 = arith.addf %13, %15 : vector<2x64xf32>
    %cst_16 = arith.constant 0.000000e+00 : f32
    %17 = vector.broadcast %cst_16 : f32 to vector<2x64xf32>
    %18 = arith.maximumf %16, %17 : vector<2x64xf32>
    %c0_17 = arith.constant 0 : index
    %c0_18 = arith.constant 0 : index
    %19 = vector.load %arg7[%c0_17, %c0_18] : memref<64x4xf32, #tpu.memory_space<vmem>>, vector<64x4xf32>
    %cst_19 = arith.constant dense<0.000000e+00> : vector<2x4xf32>
    %20 = tpu.matmul %18, %19, %cst_19 {dimension_numbers = #tpu.dot_dimension_numbers<[1], [0], [0], [1], [0, 0, 1, 1], [], []>} : vector<2x64xf32>, vector<64x4xf32>, vector<2x4xf32> -> vector<2x4xf32>
    %c0_20 = arith.constant 0 : index
    %c0_21 = arith.constant 0 : index
    %21 = vector.load %arg8[%c0_20, %c0_21] : memref<1x4xf32, #tpu.memory_space<vmem>>, vector<1x4xf32>
    %22 = vector.broadcast %21 : vector<1x4xf32> to vector<2x4xf32>
    %23 = arith.addf %20, %22 : vector<2x4xf32>
    %c0_22 = arith.constant 0 : index
    %c0_23 = arith.constant 0 : index
    %24 = vector.load %arg9[%c0_22, %c0_23] : memref<2x4xf32, #tpu.memory_space<vmem>>, vector<2x4xf32>
    tpu.vector_store %arg9[%c0_22, %c0_23], %23 {strides = array<i32>} : memref<2x4xf32, #tpu.memory_space<vmem>>, vector<2x4xf32>,
    return
  }
}

</mosaic_0001>

<bundles_post_ra>
// kernel: tpu_custom_call.1
= control target key start
LH: loop header
LB: loop body
LE: loop exit
PB: predicated region body
PF: predicated region fallthrough
CT: control target
= control target key end

     0   :  { %vm38_vm0 = vcmask 64512   ;;  %v564_v2 = vmov 0.0   ;;  %vm565_vm1 = vmmov 0   ;;  %v566_v6 = vmov 0.0|0.0   ;;  %s743_s0 = inlined_call_operand.vmem [shape: f32[2,16], index: 0, kind: input, shape index: {}]   ;;  %s744_s1 = inlined_call_operand.vmem [shape: f32[2,8], index: 1, kind: input, shape index: {}]   ;;  %s745_s2 = inlined_call_operand.vmem [shape: f32[16,128], index: 2, kind: input, shape index: {}]   ;;  %s746_s3 = inlined_call_operand.vmem [shape: f32[8,128], index: 3, kind: input, shape index: {}]   ;;  %s747_s4 = inlined_call_operand.vmem [shape: f32[1,128], index: 4, kind: input, shape index: {}]   ;;  %s748_s5 = inlined_call_operand.vmem [shape: f32[128,64], index: 5, kind: input, shape index: {}]   ;;  %s749_s6 = inlined_call_operand.vmem [shape: f32[1,64], index: 6, kind: input, shape index: {}]   ;;  %s750_s7 = inlined_call_operand.vmem [shape: f32[64,4], index: 7, kind: input, shape index: {}]   ;;  %s751_s8 = inlined_call_operand.vmem [shape: f32[1,4], index: 8, kind: input, shape index: {}]   ;;  %s752_s9 = inlined_call_operand.hbm [shape: f32[2,4], index: 9, kind: output, shape index: {}]  }
   0x1   :  { %v37_v0 = vld [vmem:[%s746_s3] sm:$0xff]  ;;  %431 = vmatprep.subr.mxu1 %v564_v2  ;;  %433 = vmatprep.mubr.msk.f32.mxu1 %vm565_vm1, %v564_v2  ;;  %v35_v4 = vld [vmem:[%s745_s2 + $0x8] sm:$0xff]  ;;  %v197_v9 = vld [vmem:[%s748_s5 + $0x10] sm:$0xff]  ;;  %vm112_vm2 = vcmask 130048  }
   0x2   :  { %v36_v1 = vld [vmem:[%s744_s1] sm:$0x3]  ;;  %432 = vmatpush3.msra.mxu1 %v37_v0  ;;  %500 = vmatprep.subr.bf16.mxu0 %v566_v6  ;;  %v196_v8 = vld [vmem:[%s748_s5 + $0x8] sm:$0xff]  ;;  %v198_v11 = vld [vmem:[%s748_s5 + $0x18] sm:$0xff] }
   0x3   :  { %v34_v3 = vld [vmem:[%s745_s2] sm:$0xff]  ;;  %434 = vmatmul.mubr.msk.f32.vlgmr.msra.gmra.mrb[0].mxu1 %vm38_vm0, %v36_v1  ;;  %497 = vmatprep.subr.bf16.mxu1 %v566_v6  ;;  %v504_v13 = vpack.c.bf16 %v198_v11, %v197_v9 }
   0x4   :  { %v498_v5 = vpack.c.bf16 %v35_v4, %v34_v3  ;;  %v195_v7 = vld [vmem:[%s748_s5] sm:$0xff]  ;;  %440 = vmatprep.mubr.msk.f32.mxu1 %vm565_vm1, %v564_v2  ;;  %475 = vmatprep.mubr.msk.f32.mxu0 %vm565_vm1, %v564_v2 }
   0x5   :  { %v501_v10 = vpack.c.bf16 %v196_v8, %v195_v7  ;;  %v33_v12 = vld [vmem:[%s743_s0] sm:$0x3] }
   0x6   :  { %499 = vmatpush3.bf16.msra.mxu1 %v498_v5 }
   0x7   :  { %502 = vmatpush3.bf16.msra.mxu0 %v501_v10 }
   0x8   :  { %14 = vsyncpa [#allocation3], 0  ;;  %503 = vmatprep.subr.bf16.mxu0 %v566_v6  ;;  %v199_v14 = vld [vmem:[%s748_s5 + $0x20] sm:$0xff]  ;;  %v200_v15 = vld [vmem:[%s748_s5 + $0x28] sm:$0xff]  ;;  %524 = vmatprep.subr.bf16.mxu1 %v566_v6  ;;  %vm304_vm3 = vcmask 523264   ;;  %s567_s19 = smov [#allocation2]  }
   0x9   :  { %441 = vmatmul.mubr.msk.f32.vlgmr.msra.gmra.mrb[2].mxu1 %vm112_vm2, %v33_v12  ;;  %v507_v16 = vpack.c.bf16 %v200_v15, %v199_v14  ;;  %v201_v17 = vld [vmem:[%s748_s5 + $0x30] sm:$0xff]  ;;  %v202_v18 = vld [vmem:[%s748_s5 + $0x38] sm:$0xff]  ;;  %v203_v20 = vld [vmem:[%s748_s5 + $0x40] sm:$0xff]  ;;  %s386_s20 = sshll.u32 %s567_s19, 4  ;;  %vm378_vm4 = vcmask 25600   ;;  %s387_s20 = int_to_ptr.vmem [resolvable:$true] %s386_s20 }
   0xa   :  { %494 = vmatprep.mubr.msk.f32.mxu1 %vm565_vm1, %v564_v2  ;;  %v510_v19 = vpack.c.bf16 %v202_v18, %v201_v17  ;;  %v204_v21 = vld [vmem:[%s748_s5 + $0x48] sm:$0xff]  ;;  %v205_v23 = vld [vmem:[%s748_s5 + $0x50] sm:$0xff]  ;;  %v206_v24 = vld [vmem:[%s748_s5 + $0x58] sm:$0xff]  ;;  %p545_p1 = scmp.lt.s32.totalorder %s387_s20, %s387_s20 }
   0xb   :  { %505 = vmatpush3.bf16.msra.mxu0 %v504_v13  ;;  %v513_v22 = vpack.c.bf16 %v204_v21, %v203_v20  ;;  %v516_v25 = vpack.c.bf16 %v206_v24, %v205_v23  ;;  %v207_v26 = vld [vmem:[%s748_s5 + $0x60] sm:$0xff]  ;;  %v208_v27 = vld [vmem:[%s748_s5 + $0x68] sm:$0xff]  ;;  %v209_v29 = vld [vmem:[%s748_s5 + $0x70] sm:$0xff] }
   0xc   :  { %506 = vmatprep.subr.bf16.mxu0 %v566_v6  ;;  %v519_v28 = vpack.c.bf16 %v208_v27, %v207_v26  ;;  %v210_v30 = vld [vmem:[%s748_s5 + $0x78] sm:$0xff]  ;;  %v289_v32 = vld [vmem:[%s750_s7] sm:$0xff]  ;;  %v290_v33 = vld [vmem:[%s750_s7 + $0x8] sm:$0xff] }
   0xd   :  { %v522_v31 = vpack.c.bf16 %v210_v30, %v209_v29  ;;  %v291_v34 = vld [vmem:[%s750_s7 + $0x10] sm:$0xff]  ;;  %v525_v35 = vpack.c.bf16 %v290_v33, %v289_v32  ;;  %v292_v36 = vld [vmem:[%s750_s7 + $0x18] sm:$0xff]  ;;  %v293_v38 = vld [vmem:[%s750_s7 + $0x20] sm:$0xff] }
   0xe   :  { %v528_v37 = vpack.c.bf16 %v292_v36, %v291_v34  ;;  %v294_v39 = vld [vmem:[%s750_s7 + $0x28] sm:$0xff]  ;;  %v396_v44 = vld [vmem:[%s747_s4] ss:$0 sm:$0xff]  ;;  %v295_v49 = vld [vmem:[%s750_s7 + $0x30] sm:$0xff] }
   0xf   :  { %508 = vmatpush3.bf16.msra.mxu0 %v507_v16  ;;  %526 = vmatpush3.bf16.msra.mxu1 %v525_v35  ;;  %v531_v40 = vpack.c.bf16 %v294_v39, %v293_v38  ;;  %v296_v50 = vld [vmem:[%s750_s7 + $0x38] sm:$0xff]  ;;  %v397_v52 = vld [vmem:[%s749_s6] ss:$0 sm:$0xff]  ;;  %s540_s7 = scalar_lea.vmem %s387_s20, 32 }
  0x10   :  { %509 = vmatprep.subr.bf16.mxu0 %v566_v6  ;;  %527 = vmatprep.subr.bf16.mxu1 %v566_v6  ;;  %v534_v51 = vpack.c.bf16 %v296_v50, %v295_v49  ;;  %v398_v57 = vld [vmem:[%s751_s8] ss:$0 sm:$0xff]  ;;  %p541_p0 = scmp.ne.s32.totalorder %s387_s20, %s540_s7  ;;  %p546_p2 = scmp.lt.s32.totalorder %s540_s7, %s540_s7 }
  0x12   :  { %p547_p3 = por %p546_p2, %p545_p1 }
  0x13   :  { %511 = vmatpush3.bf16.msra.mxu0 %v510_v19  ;;  %529 = vmatpush3.bf16.msra.mxu1 %v528_v37 }
  0x14   :  { %512 = vmatprep.subr.bf16.mxu0 %v566_v6  ;;  %530 = vmatprep.subr.bf16.mxu1 %v566_v6  ;;  %p548_p4 = pnand %p547_p3, %p541_p0 }
  0x17   :  { %514 = vmatpush3.bf16.msra.mxu0 %v513_v22  ;;  %532 = vmatpush3.bf16.msra.mxu1 %v531_v40 }
  0x18   :  { %515 = vmatprep.subr.bf16.mxu0 %v566_v6  ;;  %533 = vmatprep.subr.bf16.mxu1 %v566_v6 }
  0x1b   :  { %517 = vmatpush3.bf16.msra.mxu0 %v516_v25  ;;  %535 = vmatpush3.bf16.msra.mxu1 %v534_v51 }
  0x1c   :  { %518 = vmatprep.subr.bf16.mxu0 %v566_v6 }
  0x1f   :  { %520 = vmatpush3.bf16.msra.mxu0 %v519_v28 }
  0x20   :  { %521 = vmatprep.subr.bf16.mxu0 %v566_v6 }
  0x23   :  { %523 = vmatpush3.bf16.msra.mxu0 %v522_v31 }
  0xd6   :  { %v108_v41 = vpop.f32.mrb[0].mxu1 }
  0xd7   :  { %v435_v42 = vpop.f32.mrb[1].mxu1 }
  0xdc   :  { %v182_v43 = vpop.f32.mrb[2].mxu1 }
  0xdd   :  { %v183_v45 = vadd.f32 %v182_v43, %v108_v41  ;;  %v442_v46 = vpop.f32.mrb[3].mxu1 }
  0xdf   :  { %v193_v47 = vadd.f32 %v396_v44, %v183_v45 }
  0xe1   :  { %v194_v48 = vmax.f32 %v193_v47, 0.0 }
  0xe3   :  { %476 = vmatmul.mubr.f32.vlgmr.msra.gmra.mrb[0].mxu0 %v194_v48 }
 0x1b6   :  { %v284_v53 = vpop.f32.mrb[0].mxu0 }
 0x1b7   :  { %v285_v54 = vadd.f32 %v397_v52, %v284_v53  ;;  %v477_v55 = vpop.f32.mrb[1].mxu0 }
 0x1b9   :  { %v288_v56 = vmax.f32 %v285_v54, 0.0 }
 0x1bb   :  { %495 = vmatmul.mubr.msk.f32.vlgmr.msra.gmra.mrb[4].mxu1 %vm304_vm3, %v288_v56 }
 0x28e   :  { %v374_v58 = vpop.f32.mrb[4].mxu1 }
 0x28f   :  { %v375_v59 = vadd.f32 %v398_v57, %v374_v58  ;;  %v496_v60 = vpop.f32.mrb[5].mxu1 }
 0x291   :  { %379 = vst.msk [vmem:[#allocation2] sm:$0x3] %vm378_vm4, %v375_v59 }
 0x292   :  { %551 = shalt.err (!%p548_p4)
}
 0x293   :  { %s552_s21 = scalar_lea.hbm %s752_s9, 32 }
 0x294   :  { %p553_p5 = scmp.ne.s32.totalorder %s752_s9, %s552_s21  ;;  %p556_p6 = scmp.lt.u32.totalorder %s552_s21, %s752_s9 }
 0x296   :  { %p558_p7 = pnand %p556_p6, %p553_p5 }
 0x298   :  { %561 = shalt.err (!%p558_p7)
}
 0x299   :  { %389 = dma.vmem_to_hbm [thread:$0]  %s387_s20, 32, %s752_s9, [#allocation3]  }
 0x29a   :  { %562 = dma.done.wait [#allocation3], 32  }
 0x29b   :  { %563 = vsyncadd [#allocation3], 4294967264 }
 0x29c   :  { %393 = vsyncpa [#allocation3], 1 }

</bundles_post_ra>
